<compile_context>
chip_gen: v6e
topology: v6e:2x2x1
jax: 0.10.0
libtpu: 0.0.40
codegen_flags: <defaults>
</compile_context>

<pallas_src>
import jax
import jax.numpy as jnp
from jax.experimental import pallas as pl
from jax.experimental.pallas import tpu as pltpu


_LANE = 128        # TPU lane width; batch tiles are multiples of this.
_SMALL_K = 4       # contractions at or below this width use VPU broadcast-FMAs.


def _round_up(x, m):
    return ((x + m - 1) // m) * m


def _num_tensorcores():
    """TensorCores per chip that a 'parallel' grid axis can shard over."""
    try:
        kind = getattr(jax.devices()[0], "device_kind", "").lower()
    except Exception:
        return 1
    if "v7" in kind or "7x" in kind:
        return 2                      # v7x: 2 TCs / chip
    if "v4" in kind or "v5p" in kind:
        return 2                      # megacore
    return 1                          # v5e / v6e: single TC


def _choose_tiling(n, num_cores, max_tile):
    """Pick a lane-aligned tile so there is exactly one grid step per TensorCore
    (capped by max_tile for very large batches)."""
    assert max_tile >= _LANE and max_tile % _LANE == 0
    num_cores = max(int(num_cores), 1)
    n_lanes = _round_up(max(n, 1), _LANE)
    per_core = _round_up((n_lanes + num_cores - 1) // num_cores, _LANE)
    tile = min(per_core, max_tile)
    n_pad = _round_up(n_lanes, tile)
    return tile, n_pad, n_pad // tile


def _make_mlp_kernel(num_layers, positive, compute_dtype):
    """Kernel body for the transposed-layout MLP.

    Ref order: x_ref [in, Nt], W0 [h, in], b0 [h, 1], ..., W_{L-1}, b_{L-1},
               out_ref [out, Nt].
    Every Linear except the last is followed by tanh; optional softplus at the end.
    Weights arrive already in `compute_dtype` (pre-cast in the wrapper) except the
    tiny small-K layers, which stay f32 and run on the VPU.
    """
    cast_acts = compute_dtype != jnp.float32

    def kernel(*refs):
        x_ref = refs[0]
        o_ref = refs[-1]
        param_refs = refs[1:-1]

        h = x_ref[...].astype(jnp.float32)                 # [in_features, Nt]
        for l in range(num_layers):
            w = param_refs[2 * l][...]                     # [out_f, in_f]
            b = param_refs[2 * l + 1][...].astype(jnp.float32)  # [out_f, 1]
            k = w.shape[1]
            if k <= _SMALL_K:
                # Tiny contraction (e.g. K=2 first layer): broadcast FMAs on the
                # VPU instead of a nearly-idle MXU push.
                w32 = w.astype(jnp.float32)
                acc = w32[:, 0:1] * h[0:1, :]
                for kk in range(1, k):
                    acc = acc + w32[:, kk:kk + 1] * h[kk:kk + 1, :]
                h = acc + b
            else:
                rhs = h.astype(compute_dtype) if cast_acts else h
                h = jnp.dot(w, rhs, preferred_element_type=jnp.float32) + b
            if l < num_layers - 1:
                h = jnp.tanh(h)
        if positive:
            # softplus(x) = max(x, 0) + log1p(exp(-|x|))  (numerically stable).
            h = jnp.maximum(h, 0.0) + jnp.log1p(jnp.exp(-jnp.abs(h)))
        o_ref[...] = h.astype(o_ref.dtype)

    return kernel


def net1_forward(x, params, *, positive=False, compute_dtype=jnp.float32,
                 out_dtype=jnp.float32, max_batch_tile=32768,
                 num_tensorcores=None, x_transposed=False,
                 return_transposed=False):
    """Net1 forward pass as a single Pallas TPU kernel.

    x:      [N, input_size] (PyTorch convention) or, if `x_transposed`,
            [input_size, N] (lane-dense layout, no wrapper transpose needed).
    params: list of (W, b); W: [out_features, in_features] (PyTorch layout),
            b: [out_features, 1].
    compute_dtype: MXU operand dtype for the >SMALL_K layers.  bf16 halves the
            resident weight VMEM/operand traffic (accumulation stays f32) but
            loosens accuracy to ~1e-2; default f32 keeps 1e-5 accuracy.
    out_dtype: kernel output dtype (bf16 halves the output writeback).
    num_tensorcores: grid steps = TensorCores; autodetected if None
            (v5e/v6e -> 1, v7x -> 2).
    x_transposed / return_transposed: keep activations in [features, batch]
            layout end-to-end and skip the wrapper-side HBM transpose passes.
    """
    if x_transposed:
        in_dim, n = x.shape
        xt = x
    else:
        n, in_dim = x.shape
        xt = x.T                                           # [in_dim, N]

    num_layers = len(params)
    out_dim = params[-1][0].shape[0]

    if num_tensorcores is None:
        num_tensorcores = _num_tensorcores()
    tile, n_pad, grid_len = _choose_tiling(n, num_tensorcores, max_batch_tile)

    if n_pad != n:
        xt = jnp.pad(xt, ((0, 0), (0, n_pad - n)))

    # Pre-cast the MXU-path weights once in the wrapper (no per-step casts in
    # the kernel).  Biases stay f32 (added to the f32 accumulator).
    flat_params = []
    for (w, b) in params:
        if w.shape[1] > _SMALL_K and compute_dtype != jnp.float32:
            w = w.astype(compute_dtype)
        flat_params.extend([w, b])

    kernel = _make_mlp_kernel(num_layers, positive, compute_dtype)

    # Lane-dense specs: batch lives on the last (lane) axis everywhere.
    in_specs = [pl.BlockSpec((in_dim, tile), lambda i: (0, i))]
    for p in flat_params:
        # Weights/biases are tiny; full-array blocks with a constant index_map
        # stay resident in VMEM (no re-DMA across grid steps).
        in_specs.append(pl.BlockSpec(p.shape, lambda i: (0, 0)))
    out_spec = pl.BlockSpec((out_dim, tile), lambda i: (0, i))

    # Advisory cost estimate so XLA schedules the surrounding layout ops well.
    flops = 0
    transcendentals = 0
    param_bytes = 0
    for l, (w, b) in enumerate(params):
        out_f, in_f = w.shape
        flops += n_pad * (2 * out_f * in_f + out_f)
        if l < num_layers - 1:
            transcendentals += n_pad * out_f
        param_bytes += w.size * w.dtype.itemsize + b.size * b.dtype.itemsize
    if positive:
        transcendentals += n_pad * out_dim
    bytes_accessed = (in_dim * n_pad * 4
                      + out_dim * n_pad * jnp.dtype(out_dtype).itemsize
                      + param_bytes)
    cost = pl.CostEstimate(flops=int(flops),
                           transcendentals=int(transcendentals),
                           bytes_accessed=int(bytes_accessed))

    out_t = pl.pallas_call(
        kernel,
        out_shape=jax.ShapeDtypeStruct((out_dim, n_pad), out_dtype),
        grid_spec=pltpu.PrefetchScalarGridSpec(
            num_scalar_prefetch=0,
            grid=(grid_len,),
            in_specs=in_specs,
            out_specs=out_spec,
        ),
        compiler_params=pltpu.CompilerParams(
            dimension_semantics=("parallel",)),
        cost_estimate=cost,
    )(xt, *flat_params)

    if return_transposed:
        return out_t[:, :n] if n_pad != n else out_t      # [out_dim, N]
    out = out_t.T                                          # [n_pad, out_dim]
    if n_pad != n:
        out = out[:n]
    return out


def init_net1_params(key, input_size, nn_width, nn_num_layers, output_size):
    """Parameter init mirroring Net1.__init__ layer shapes (PyTorch [out, in]).

    First-layer weight is Xavier-normal (as in the module); the rest use the
    default nn.Linear uniform init.  Biases are stored as [out, 1].
    """
    dims = [input_size] + [nn_width] * nn_num_layers + [output_size]
    params = []
    for l in range(len(dims) - 1):
        fan_in, fan_out = dims[l], dims[l + 1]
        key, kw, kb = jax.random.split(key, 3)
        if l == 0:
            std = (2.0 / (fan_in + fan_out)) ** 0.5
            w = std * jax.random.normal(kw, (fan_out, fan_in), dtype=jnp.float32)
        else:
            bound = 1.0 / (fan_in ** 0.5)
            w = jax.random.uniform(kw, (fan_out, fan_in), minval=-bound,
                                   maxval=bound, dtype=jnp.float32)
        bound_b = 1.0 / (fan_in ** 0.5)
        b = jax.random.uniform(kb, (fan_out, 1), minval=-bound_b,
                               maxval=bound_b, dtype=jnp.float32)
        params.append((w, b))
    return params


def net1_reference(x, params, positive=False):
    """Pure-JAX reference for correctness checking."""
    h = x
    for l, (w, b) in enumerate(params):
        h = h @ w.T + b.reshape(1, -1)
        if l < len(params) - 1:
            h = jnp.tanh(h)
    if positive:
        h = jax.nn.softplus(h)
    return h


# TODO(synk): the autograd-based derivative dictionary (get_all_derivs) has no clean
# single-kernel Pallas equivalent; only the forward pass is implemented here (use
# jax.grad / jax.jacfwd on net1_forward for derivatives).

if __name__ == "__main__":
    # Net1(output_size=4, nn_width=32, nn_num_layers=2, input_names=['x','y'])
    input_size = 2      # len(['x', 'y'])
    nn_width = 32
    nn_num_layers = 2
    output_size = 4
    positive = False
    batch = 1024        # grid = 1 step on v5e/v6e, 2 steps (one per TC) on v7x

    key = jax.random.PRNGKey(0)
    key, kx = jax.random.split(key)
    x = jax.random.normal(kx, (batch, input_size), dtype=jnp.float32)
    params = init_net1_params(key, input_size, nn_width, nn_num_layers, output_size)

    # Jit the wrapper so the (tiny) transpose/pad/slice layout ops fuse around
    # the custom call instead of being separate HBM passes.
    fwd = jax.jit(lambda xx: net1_forward(xx, params, positive=positive))
    out = jax.block_until_ready(fwd(x))

    ref = net1_reference(x, params, positive=positive)
    assert out.shape == (batch, output_size)
    assert jnp.allclose(out, ref, atol=1e-5, rtol=1e-5), "mismatch vs reference"

    # Ragged-batch path (minimal lane padding: 300 -> 384 on 1-TC chips).
    x_ragged = x[:300]
    fwd_r = jax.jit(lambda xx: net1_forward(xx, params, positive=positive))
    out_r = jax.block_until_ready(fwd_r(x_ragged))
    ref_r = net1_reference(x_ragged, params, positive=positive)
    assert out_r.shape == (300, output_size)
    assert jnp.allclose(out_r, ref_r, atol=1e-5, rtol=1e-5), "ragged mismatch"

    # Fully lane-dense path: caller keeps activations in [features, batch]
    # layout, so no wrapper-side transpose passes at all.
    out_td = jax.block_until_ready(
        net1_forward(x.T, params, positive=positive,
                     x_transposed=True, return_transposed=True))
    assert out_td.shape == (output_size, batch)
    assert jnp.allclose(out_td.T, ref, atol=1e-5, rtol=1e-5), "transposed mismatch"

    print("KERNEL_OK")
</pallas_src>

<mosaic_0001>
module attributes {stable_mosaic.version = 11 : i64} {
  func.func @kernel(%arg0: i32, %arg1: memref<2x1024xf32, #tpu.memory_space<vmem>>, %arg2: memref<32x2xf32, #tpu.memory_space<vmem>>, %arg3: memref<32x1xf32, #tpu.memory_space<vmem>>, %arg4: memref<32x32xf32, #tpu.memory_space<vmem>>, %arg5: memref<32x1xf32, #tpu.memory_space<vmem>>, %arg6: memref<4x32xf32, #tpu.memory_space<vmem>>, %arg7: memref<4x1xf32, #tpu.memory_space<vmem>>, %arg8: memref<4x1024xf32, #tpu.memory_space<vmem>>) attributes {dimension_semantics = [#tpu.dimension_semantics<parallel>], iteration_bounds = array<i64: 1>, scalar_prefetch = 0 : i64, scratch_operands = 0 : i64, tpu.core_type = #tpu.core_type<tc>, window_params = [{transform_indices = @transform_0, window_bounds = array<i64: 2, 1024>}, {pipeline_mode = #tpu.pipeline_mode<synchronous>, transform_indices = @transform_1, window_bounds = array<i64: 32, 2>}, {pipeline_mode = #tpu.pipeline_mode<synchronous>, transform_indices = @transform_2, window_bounds = array<i64: 32, 1>}, {pipeline_mode = #tpu.pipeline_mode<synchronous>, transform_indices = @transform_3, window_bounds = array<i64: 32, 32>}, {pipeline_mode = #tpu.pipeline_mode<synchronous>, transform_indices = @transform_4, window_bounds = array<i64: 32, 1>}, {pipeline_mode = #tpu.pipeline_mode<synchronous>, transform_indices = @transform_5, window_bounds = array<i64: 4, 32>}, {pipeline_mode = #tpu.pipeline_mode<synchronous>, transform_indices = @transform_6, window_bounds = array<i64: 4, 1>}, {transform_indices = @transform_7, window_bounds = array<i64: 4, 1024>}]} {
    %c0 = arith.constant 0 : index
    %c0_0 = arith.constant 0 : index
    %0 = vector.load %arg1[%c0, %c0_0] : memref<2x1024xf32, #tpu.memory_space<vmem>>, vector<2x1024xf32>
    %c0_1 = arith.constant 0 : index
    %c0_2 = arith.constant 0 : index
    %1 = vector.load %arg2[%c0_1, %c0_2] : memref<32x2xf32, #tpu.memory_space<vmem>>, vector<32x2xf32>
    %c0_3 = arith.constant 0 : index
    %c0_4 = arith.constant 0 : index
    %2 = vector.load %arg3[%c0_3, %c0_4] : memref<32x1xf32, #tpu.memory_space<vmem>>, vector<32x1xf32>
    %3 = vector.extract_strided_slice %1 {offsets = [0, 0], sizes = [32, 1], strides = [1, 1]} : vector<32x2xf32> to vector<32x1xf32>
    %4 = vector.extract_strided_slice %0 {offsets = [0, 0], sizes = [1, 1024], strides = [1, 1]} : vector<2x1024xf32> to vector<1x1024xf32>
    %5 = vector.broadcast %3 : vector<32x1xf32> to vector<32x1024xf32>
    %6 = vector.broadcast %4 : vector<1x1024xf32> to vector<32x1024xf32>
    %7 = arith.mulf %5, %6 : vector<32x1024xf32>
    %8 = vector.extract_strided_slice %1 {offsets = [0, 1], sizes = [32, 1], strides = [1, 1]} : vector<32x2xf32> to vector<32x1xf32>
    %9 = vector.extract_strided_slice %0 {offsets = [1, 0], sizes = [1, 1024], strides = [1, 1]} : vector<2x1024xf32> to vector<1x1024xf32>
    %10 = vector.broadcast %8 : vector<32x1xf32> to vector<32x1024xf32>
    %11 = vector.broadcast %9 : vector<1x1024xf32> to vector<32x1024xf32>
    %12 = arith.mulf %10, %11 : vector<32x1024xf32>
    %13 = arith.addf %7, %12 : vector<32x1024xf32>
    %14 = vector.broadcast %2 : vector<32x1xf32> to vector<32x1024xf32>
    %15 = arith.addf %13, %14 : vector<32x1024xf32>
    %16 = math.tanh %15 : vector<32x1024xf32>
    %c0_5 = arith.constant 0 : index
    %c0_6 = arith.constant 0 : index
    %17 = vector.load %arg4[%c0_5, %c0_6] : memref<32x32xf32, #tpu.memory_space<vmem>>, vector<32x32xf32>
    %c0_7 = arith.constant 0 : index
    %c0_8 = arith.constant 0 : index
    %18 = vector.load %arg5[%c0_7, %c0_8] : memref<32x1xf32, #tpu.memory_space<vmem>>, vector<32x1xf32>
    %cst = arith.constant dense<0.000000e+00> : vector<32x1024xf32>
    %19 = tpu.matmul %17, %16, %cst {dimension_numbers = #tpu.dot_dimension_numbers<[1], [0], [0], [1], [0, 0, 1, 1], [], []>} : vector<32x32xf32>, vector<32x1024xf32>, vector<32x1024xf32> -> vector<32x1024xf32>
    %20 = vector.broadcast %18 : vector<32x1xf32> to vector<32x1024xf32>
    %21 = arith.addf %19, %20 : vector<32x1024xf32>
    %22 = math.tanh %21 : vector<32x1024xf32>
    %c0_9 = arith.constant 0 : index
    %c0_10 = arith.constant 0 : index
    %23 = vector.load %arg6[%c0_9, %c0_10] : memref<4x32xf32, #tpu.memory_space<vmem>>, vector<4x32xf32>
    %c0_11 = arith.constant 0 : index
    %c0_12 = arith.constant 0 : index
    %24 = vector.load %arg7[%c0_11, %c0_12] : memref<4x1xf32, #tpu.memory_space<vmem>>, vector<4x1xf32>
    %cst_13 = arith.constant dense<0.000000e+00> : vector<4x1024xf32>
    %25 = tpu.matmul %23, %22, %cst_13 {dimension_numbers = #tpu.dot_dimension_numbers<[1], [0], [0], [1], [0, 0, 1, 1], [], []>} : vector<4x32xf32>, vector<32x1024xf32>, vector<4x1024xf32> -> vector<4x1024xf32>
    %26 = vector.broadcast %24 : vector<4x1xf32> to vector<4x1024xf32>
    %27 = arith.addf %25, %26 : vector<4x1024xf32>
    %c0_14 = arith.constant 0 : index
    %c0_15 = arith.constant 0 : index
    %28 = vector.load %arg8[%c0_14, %c0_15] : memref<4x1024xf32, #tpu.memory_space<vmem>>, vector<4x1024xf32>
    tpu.vector_store %arg8[%c0_14, %c0_15], %27 {strides = array<i32>} : memref<4x1024xf32, #tpu.memory_space<vmem>>, vector<4x1024xf32>,
    return
  }
  func.func @transform_0(%arg0: i32) -> (i32, i32) {
    %c0_i32 = arith.constant 0 : i32
    %c0_i32_0 = arith.constant 0 : i32
    return %c0_i32, %arg0 : i32, i32
  }
  func.func @transform_1(%arg0: i32) -> (i32, i32) {
    %c0_i32 = arith.constant 0 : i32
    %c0_i32_0 = arith.constant 0 : i32
    %c0_i32_1 = arith.constant 0 : i32
    return %c0_i32, %c0_i32_0 : i32, i32
  }
  func.func @transform_2(%arg0: i32) -> (i32, i32) {
    %c0_i32 = arith.constant 0 : i32
    %c0_i32_0 = arith.constant 0 : i32
    %c0_i32_1 = arith.constant 0 : i32
    return %c0_i32, %c0_i32_0 : i32, i32
  }
  func.func @transform_3(%arg0: i32) -> (i32, i32) {
    %c0_i32 = arith.constant 0 : i32
    %c0_i32_0 = arith.constant 0 : i32
    %c0_i32_1 = arith.constant 0 : i32
    return %c0_i32, %c0_i32_0 : i32, i32
  }
  func.func @transform_4(%arg0: i32) -> (i32, i32) {
    %c0_i32 = arith.constant 0 : i32
    %c0_i32_0 = arith.constant 0 : i32
    %c0_i32_1 = arith.constant 0 : i32
    return %c0_i32, %c0_i32_0 : i32, i32
  }
  func.func @transform_5(%arg0: i32) -> (i32, i32) {
    %c0_i32 = arith.constant 0 : i32
    %c0_i32_0 = arith.constant 0 : i32
    %c0_i32_1 = arith.constant 0 : i32
    return %c0_i32, %c0_i32_0 : i32, i32
  }
  func.func @transform_6(%arg0: i32) -> (i32, i32) {
    %c0_i32 = arith.constant 0 : i32
    %c0_i32_0 = arith.constant 0 : i32
    %c0_i32_1 = arith.constant 0 : i32
    return %c0_i32, %c0_i32_0 : i32, i32
  }
  func.func @transform_7(%arg0: i32) -> (i32, i32) {
    %c0_i32 = arith.constant 0 : i32
    %c0_i32_0 = arith.constant 0 : i32
    return %c0_i32, %arg0 : i32, i32
  }
}

</mosaic_0001>

<bundles_post_ra>
// kernel: _lambda_.1
= control target key start
LH: loop header
LB: loop body
LE: loop exit
PB: predicated region body
PF: predicated region fallthrough
CT: control target
= control target key end

     0   :  { %12 = vsyncpa [#allocation3], 0  ;;  %s1953_s0 = inlined_call_operand.hbm [shape: f32[2,1024], index: 0, kind: input, shape index: {}]   ;;  %s1954_s1 = inlined_call_operand.hbm [shape: f32[32,2], index: 1, kind: input, shape index: {}]   ;;  %s1955_s2 = inlined_call_operand.hbm [shape: f32[32,1], index: 2, kind: input, shape index: {}]   ;;  %s1956_s3 = inlined_call_operand.hbm [shape: f32[32,32], index: 3, kind: input, shape index: {}]   ;;  %s1957_s4 = inlined_call_operand.hbm [shape: f32[32,1], index: 4, kind: input, shape index: {}]   ;;  %s1958_s5 = inlined_call_operand.vmem [shape: f32[4,32], index: 5, kind: input, shape index: {}]   ;;  %s1959_s6 = inlined_call_operand.vmem [shape: f32[4,1], index: 6, kind: input, shape index: {}]   ;;  %s1960_s7 = inlined_call_operand.hbm [shape: f32[4,1024], index: 7, kind: output, shape index: {}]  }
   0x1   :  { %13 = vsyncpa [#allocation6], 0 }
   0x2   :  { %14 = vsyncpa [#allocation9], 0 }
   0x3   :  { %15 = vsyncpa [#allocation4], 0  ;;  %s1519_s24 = smov [#allocation5]  }
   0x4   :  { %s31_s25 = sshll.u32 %s1519_s24, 4  ;;  %s32_s25 = int_to_ptr.vmem [resolvable:$true] %s31_s25 }
   0x5   :  { %s1399_s26 = scalar_lea.vmem %s32_s25, 512  ;;  %p1404_p1 = scmp.lt.s32.totalorder %s32_s25, %s32_s25 }
   0x6   :  { %p1400_p0 = scmp.ne.s32.totalorder %s32_s25, %s1399_s26  ;;  %p1405_p2 = scmp.lt.s32.totalorder %s1399_s26, %s1399_s26 }
   0x8   :  { %p1406_p3 = por %p1405_p2, %p1404_p1 }
   0xa   :  { %p1407_p4 = pnand %p1406_p3, %p1400_p0 }
   0xc   :  { %1410 = shalt.err (!%p1407_p4)
}
   0xd   :  { %s1520_s27 = smov 128   ;;  %s1521_s28 = smov 8  }
   0xe   :  { %37 = dma.hbm_to_vmem [thread:$0]  %s1954_s1, 512, %s32_s25, [#allocation6], %s1520_s27, %s1520_s27, %s1521_s28  }
   0xf   :  { %s1522_s8 = smov [#allocation8]   ;;  %s1523_s10 = smov [#allocation2]  }
  0x10   :  { %s55_s9 = sshll.u32 %s1522_s8, 4  ;;  %s22_s11 = sshll.u32 %s1523_s10, 4  ;;  %s56_s9 = int_to_ptr.vmem [resolvable:$true] %s55_s9  ;;  %s23_s11 = int_to_ptr.vmem [resolvable:$true] %s22_s11 }
  0x11   :  { %s1419_s12 = scalar_lea.vmem %s56_s9, 512  ;;  %p1424_p6 = scmp.lt.s32.totalorder %s56_s9, %s56_s9 }
  0x12   :  { %p1420_p5 = scmp.ne.s32.totalorder %s56_s9, %s1419_s12  ;;  %p1425_p7 = scmp.lt.s32.totalorder %s1419_s12, %s1419_s12 }
  0x14   :  { %p1426_p8 = por %p1425_p7, %p1424_p6 }
  0x16   :  { %p1427_p9 = pnand %p1426_p8, %p1420_p5 }
  0x18   :  { %1430 = shalt.err (!%p1427_p9)
}
  0x19   :  { %61 = dma.hbm_to_vmem [thread:$0]  %s1956_s3, 512, %s56_s9, [#allocation9], %s1520_s27, %s1520_s27, %s1521_s28  }
  0x1a   :  { %s1439_s1 = scalar_lea.vmem %s23_s11, 256  ;;  %p1444_p11 = scmp.lt.s32.totalorder %s23_s11, %s23_s11 }
  0x1b   :  { %p1440_p10 = scmp.ne.s32.totalorder %s23_s11, %s1439_s1  ;;  %p1445_p12 = scmp.lt.s32.totalorder %s1439_s1, %s1439_s1 }
  0x1d   :  { %p1446_p13 = por %p1445_p12, %p1444_p11 }
  0x1f   :  { %p1447_p0 = pnand %p1446_p13, %p1440_p10 }
  0x21   :  { %1450 = shalt.err (!%p1447_p0)
}
  0x22   :  { %25 = dma.hbm_to_vmem [thread:$0]  %s1953_s0, 256, %s23_s11, [#allocation3]  }
  0x23   :  { %s1524_s17 = smov [#allocation7]   ;;  %s1525_s19 = smov [#allocation10]  }
  0x24   :  { %s43_s18 = sshll.u32 %s1524_s17, 4  ;;  %s67_s20 = sshll.u32 %s1525_s19, 4  ;;  %s44_s18 = int_to_ptr.vmem [resolvable:$true] %s43_s18  ;;  %s68_s20 = int_to_ptr.vmem [resolvable:$true] %s67_s20 }
  0x25   :  { %s1459_s21 = scalar_lea.vmem %s44_s18, 512  ;;  %p1464_p2 = scmp.lt.s32.totalorder %s44_s18, %s44_s18 }
  0x26   :  { %p1460_p1 = scmp.ne.s32.totalorder %s44_s18, %s1459_s21  ;;  %p1465_p3 = scmp.lt.s32.totalorder %s1459_s21, %s1459_s21 }
  0x28   :  { %p1466_p4 = por %p1465_p3, %p1464_p2 }
  0x2a   :  { %p1467_p5 = pnand %p1466_p4, %p1460_p1 }
  0x2c   :  { %1470 = shalt.err (!%p1467_p5)
}
  0x2d   :  { %49 = dma.hbm_to_vmem [thread:$0]  %s1955_s2, 512, %s44_s18, [#allocation6], %s1520_s27, %s1520_s27, %s1521_s28  }
  0x2e   :  { %s1479_s0 = scalar_lea.vmem %s68_s20, 512  ;;  %p1484_p7 = scmp.lt.s32.totalorder %s68_s20, %s68_s20 }
  0x2f   :  { %p1480_p6 = scmp.ne.s32.totalorder %s68_s20, %s1479_s0  ;;  %p1485_p8 = scmp.lt.s32.totalorder %s1479_s0, %s1479_s0 }
  0x31   :  { %p1486_p9 = por %p1485_p8, %p1484_p7 }
  0x33   :  { %p1487_p10 = pnand %p1486_p9, %p1480_p6 }
  0x35   :  { %1490 = shalt.err (!%p1487_p10)
}
  0x36   :  { %73 = dma.hbm_to_vmem [thread:$0]  %s1957_s4, 512, %s68_s20, [#allocation9], %s1520_s27, %s1520_s27, %s1521_s28  }
  0x37   :  { %1511 = dma.done.wait [#allocation3], 256  }
  0x38   :  { %1512 = vsyncadd [#allocation3], 4294967040 }
  0x39   :  { %1513 = dma.done.wait [#allocation6], 1024  }
  0x3a   :  { %1514 = vsyncadd [#allocation6], 4294966272 }
  0x3b   :  { %1515 = dma.done.wait [#allocation9], 1024  }
  0x3c   :  { %1516 = vsyncadd [#allocation9], 4294966272  ;;  %v1526_v0 = vmov 1   ;;  %v1527_v1 = vmov 0   ;;  %v98_v2 = vld [vmem:[#allocation5 + $0x18] sm:$0xff]  ;;  %v97_v3 = vld [vmem:[#allocation5 + $0x10] sm:$0xff]  ;;  %v125_v16 = vlaneseq }
  0x3d   :  { %1256 = vset.pattern.permute.xlu0 %v1526_v0  ;;  %1257 = vset.pattern.permute.xlu1 %v1527_v1  ;;  %v96_v4 = vld [vmem:[#allocation5 + $0x8] sm:$0xff]  ;;  %v95_v5 = vld [vmem:[#allocation5] sm:$0xff]  ;;  %v102_v6 = vld [vmem:[#allocation7 + $0x18] sm:$0xff]  ;;  %v1961_v15 = vmov 0.0   ;;  %vm493_vm0 = vcmask 261120  }
  0x3e   :  { %242 = vperm.xlu0 %1256, %v98_v2   ;;  %115 = vperm.xlu1 %1257, %v97_v3   ;;  %v100_v7 = vld [vmem:[#allocation7 + $0x8] sm:$0xff]  ;;  %v472_v8 = vld [vmem:[#allocation10 + $0x18] sm:$0xff]  ;;  %v101_v9 = vld [vmem:[#allocation7 + $0x10] sm:$0xff]  ;;  %v126_v17 = vshrl.u32 %v125_v16, 7 }
  0x3f   :  { %v470_v10 = vld [vmem:[#allocation10 + $0x8] sm:$0xff]  ;;  %v99_v11 = vld [vmem:[#allocation7] sm:$0xff]  ;;  %v895_v12 = vld [vmem:[%s1959_s6] sm:$0xf]  ;;  %570 = vmatprep.mubr.f32.mxu0 %v1961_v15  ;;  %659 = vmatprep.mubr.f32.mxu1 %v1961_v15 }
  0x40   :  { %v471_v13 = vld [vmem:[#allocation10 + $0x10] sm:$0xff]  ;;  %v469_v14 = vld [vmem:[#allocation10] sm:$0xff]  ;;  %v127_v20 = vsub.s32 0, %v126_v17  ;;  %v135_v21 = vsub.s32 4, %v126_v17  ;;  %v131_v23 = vsub.s32 2, %v126_v17  ;;  %v251_v24 = vsub.s32 3, %v126_v17 }
  0x41   :  { %v93_v22 = vld [vmem:[#allocation2] sm:$0xff]  ;;  %v247_v25 = vsub.s32 1, %v126_v17  ;;  %v255_v26 = vsub.s32 5, %v126_v17  ;;  %v94_v29 = vld [vmem:[#allocation2 + $0x8] sm:$0xff]  ;;  %v139_v32 = vsub.s32 6, %v126_v17  ;;  %v259_v35 = vsub.s32 7, %v126_v17 }
  0x42   :  { %1258 = vset.pattern.permute.xlu1 %v1526_v0  ;;  %234 = vperm.xlu0 %1256, %v96_v4   ;;  %v128_v30 = vrot.slane %v93_v22, %v127_v20  ;;  %v136_v31 = vrot.slane %v93_v22, %v135_v21  ;;  %v132_v33 = vrot.slane %v93_v22, %v131_v23 }
  0x43   :  { %238 = vperm.xlu1 %1258, %v97_v3   ;;  %v252_v34 = vrot.slane %v93_v22, %v251_v24  ;;  %v144_v36 = vrot.slane %v94_v29, %v127_v20  ;;  %v152_v37 = vrot.slane %v94_v29, %v135_v21  ;;  %v264_v38 = vrot.slane %v94_v29, %v247_v25 }
  0x44   :  { %v272_v39 = vrot.slane %v94_v29, %v255_v26  ;;  %v1610_v40 = vrot.slane %v128_v30, %v127_v20  ;;  %v1612_v41 = vrot.slane %v136_v31, %v127_v20  ;;  %v248_v42 = vrot.slane %v93_v22, %v247_v25 }
  0x45   :  { %v256_v43 = vrot.slane %v93_v22, %v255_v26  ;;  %v148_v46 = vrot.slane %v94_v29, %v131_v23  ;;  %v268_v47 = vrot.slane %v94_v29, %v251_v24  ;;  %v140_v48 = vrot.slane %v93_v22, %v139_v32 }
  0x46   :  { %1260 = vset.pattern.permute.xlu0 %v1527_v1  ;;  %v156_v49 = vrot.slane %v94_v29, %v139_v32  ;;  %v1618_v50 = vrot.slane %v132_v33, %v127_v20  ;;  %v1620_v51 = vrot.slane %v252_v34, %v247_v25  ;;  %v260_v52 = vrot.slane %v93_v22, %v259_v35 }
  0x47   :  { %1259 = vset.pattern.permute.xlu1 %v1527_v1  ;;  %120 = vperm.xlu0 %1260, %v98_v2   ;;  %v276_v53 = vrot.slane %v94_v29, %v259_v35  ;;  %v1622_v54 = vrot.slane %v144_v36, %v127_v20  ;;  %v1624_v55 = vrot.slane %v152_v37, %v127_v20 }
  0x48   :  { %110 = vperm.xlu1 %1259, %v96_v4   ;;  %v1626_v56 = vrot.slane %v264_v38, %v247_v25  ;;  %v1628_v57 = vrot.slane %v272_v39, %v247_v25  ;;  %v288_v58 = vrot.slane %v248_v42, %v247_v25  ;;  %v1630_v59 = vrot.slane %v256_v43, %v247_v25 }
  0x49   :  { %v1638_v63 = vrot.slane %v148_v46, %v127_v20  ;;  %v1644_v2 = vrot.slane %v156_v49, %v127_v20 }
  0x4a   :  { %1964 = vst [vmem:[#allocation16_spill] sm:$0xff] %v1628_v57 }
  0x4b   :  { %105 = vperm.xlu0 %1260, %v95_v5  }
  0x4c   :  { %398 = vperm.xlu1 %1259, %v102_v6   ;;  %v1652_v6 = vrot.slane %v276_v53, %v247_v25 }
  0x4f   :  { %388 = vperm.xlu0 %1260, %v100_v7  }
  0x50   :  { %1261 = vset.pattern.permute.xlu1 %v1526_v0  ;;  %v1640_v0 = vrot.slane %v268_v47, %v247_v25 }
  0x51   :  { %230 = vperm.xlu1 %1261, %v95_v5   ;;  %v1650_v5 = vrot.slane %v260_v52, %v247_v25 }
  0x53   :  { %490 = vperm.xlu0 %1260, %v472_v8  }
  0x55   :  { %1262 = vset.pattern.permute.xlu1 %v1527_v1  ;;  %v1642_v1 = vrot.slane %v140_v48, %v127_v20 }
  0x56   :  { %393 = vperm.xlu1 %1262, %v101_v9  }
  0x57   :  { %480 = vperm.xlu0 %1260, %v470_v10  }
  0x5a   :  { %383 = vperm.xlu1 %1262, %v99_v11  }
  0x5b   :  { %898 = vperm.xlu0 %1260, %v895_v12  }
  0x5e   :  { %485 = vperm.xlu1 %1262, %v471_v13  }
  0x62   :  { %475 = vperm.xlu1 %1262, %v469_v14  }
  0xb9   :  { %v1602_v18 = vpop.permute.xlu1 %115  ;;  %v1604_v19 = vpop.permute.xlu0 %242 }
  0xba   :  { %v342_v62 = vmul.f32 %v1620_v51, %v1604_v19  ;;  %v213_v3 = vmul.f32 %v1610_v40, %v1602_v18  ;;  %v215_v4 = vmul.f32 %v1612_v41, %v1602_v18  ;;  %v1656_v7 = vmul.f32 %v1622_v54, %v1602_v18 }
  0xbb   :  { %v1660_v8 = vmul.f32 %v1624_v55, %v1602_v18  ;;  %v345_v9 = vmul.f32 %v1626_v56, %v1604_v19  ;;  %v347_v11 = vmul.f32 %v1628_v57, %v1604_v19  ;;  %v214_v14 = vmul.f32 %v1618_v50, %v1602_v18 }
  0xbc   :  { %v1678_v20 = vmul.f32 %v1638_v63, %v1602_v18  ;;  %v1682_v21 = vmul.f32 %v1640_v0, %v1604_v19  ;;  %v216_v22 = vmul.f32 %v1642_v1, %v1602_v18  ;;  %v1688_v23 = vmul.f32 %v1644_v2, %v1602_v18 }
  0xbd   :  { %v1608_v28 = vpop.permute.xlu0 %234  ;;  %v344_v24 = vmul.f32 %v1650_v5, %v1604_v19  ;;  %v1694_v25 = vmul.f32 %v1652_v6, %v1604_v19  ;;  %v341_v26 = vmul.f32 %v288_v58, %v1604_v19  ;;  %v343_v29 = vmul.f32 %v1630_v59, %v1604_v19 }
  0xbe   :  { %v1606_v27 = vpop.permute.xlu1 %238  ;;  %v325_v30 = vmul.f32 %v288_v58, %v1608_v28  ;;  %v327_v31 = vmul.f32 %v1630_v59, %v1608_v28  ;;  %v1716_v38 = vmul.f32 %v1626_v56, %v1608_v28  ;;  %v1720_v39 = vmul.f32 %v1628_v57, %v1608_v28 }
  0xbf   :  { %v333_v33 = vmul.f32 %v288_v58, %v1606_v27  ;;  %v335_v19 = vmul.f32 %v1630_v59, %v1606_v27  ;;  %v1712_v37 = vmul.f32 %v1626_v56, %v1606_v27  ;;  %v1724_v42 = vmul.f32 %v1628_v57, %v1606_v27 }
  0xc0   :  { %v326_v48 = vmul.f32 %v1620_v51, %v1608_v28  ;;  %v334_v49 = vmul.f32 %v1620_v51, %v1606_v27 }
  0xc2   :  { %v1616_v45 = vpop.permute.xlu0 %120  ;;  %v366_v57 = vadd.f32 %v334_v49, %v214_v14 }
  0xc3   :  { %v1614_v44 = vpop.permute.xlu1 %110  ;;  %v222_v61 = vmul.f32 %v1618_v50, %v1616_v45  ;;  %v225_v10 = vmul.f32 %v1622_v54, %v1616_v45  ;;  %v227_v12 = vmul.f32 %v1624_v55, %v1616_v45 }
  0xc4   :  { %v205_v18 = vmul.f32 %v1610_v40, %v1614_v44  ;;  %v207_v34 = vmul.f32 %v1612_v41, %v1614_v44  ;;  %v206_v47 = vmul.f32 %v1618_v50, %v1614_v44 }
  0xc5   :  { %v374_v16 = vadd.f32 %v342_v62, %v222_v61  ;;  %v377_v32 = vadd.f32 %v345_v9, %v225_v10  ;;  %v379_v35 = vadd.f32 %v347_v11, %v227_v12  ;;  %v1739_v61 = vmul.f32 %v1640_v0, %v1608_v28 }
  0xc6   :  { %v1670_v13 = vpop.permute.xlu0 %105  ;;  %v357_v53 = vadd.f32 %v325_v30, %v205_v18  ;;  %v1743_v62 = vmul.f32 %v1640_v0, %v1606_v27  ;;  %v359_v10 = vadd.f32 %v327_v31, %v207_v34  ;;  %v365_v11 = vadd.f32 %v333_v33, %v213_v3 }
  0xc7   :  { %v1632_v60 = vpop.permute.xlu1 %398  ;;  %1965 = vst [vmem:[#allocation17_spill] sm:$0xff] %v1739_v61  ;;  %v197_v12 = vmul.f32 %v1610_v40, %v1670_v13  ;;  %v367_v18 = vadd.f32 %v335_v19, %v215_v4  ;;  %v358_v15 = vadd.f32 %v326_v48, %v206_v47  ;;  %v224_v61 = vmul.f32 %v1642_v1, %v1616_v45 }
  0xc8   :  { %v426_v36 = vadd.f32 %v1632_v60, %v374_v16  ;;  %v429_v52 = vadd.f32 %v1632_v60, %v377_v32  ;;  %v431_v9 = vadd.f32 %v1632_v60, %v379_v35  ;;  %v328_v3 = vmul.f32 %v1650_v5, %v1608_v28 }
  0xc9   :  { %v336_v31 = vmul.f32 %v1650_v5, %v1606_v27  ;;  %v221_v33 = vmul.f32 %v1610_v40, %v1616_v45  ;;  %v226_v4 = vmul.f32 %v1638_v63, %v1616_v45  ;;  %v223_v34 = vmul.f32 %v1612_v41, %v1616_v45 }
  0xca   :  { %v1726_v43 = vpop.permute.xlu0 %388  ;;  %1263 = vtanh.f32 %v426_v36  ;;  %v198_v19 = vmul.f32 %v1618_v50, %v1670_v13  ;;  %v200_v47 = vmul.f32 %v1642_v1, %v1670_v13  ;;  %v376_v48 = vadd.f32 %v344_v24, %v224_v61 }
  0xcb   :  { %v409_v16 = vadd.f32 %v1726_v43, %v357_v53  ;;  %v411_v32 = vadd.f32 %v1726_v43, %v359_v10  ;;  %1265 = vtanh.f32 %v429_v52  ;;  %v410_v14 = vadd.f32 %v1726_v43, %v358_v15 }
  0xcc   :  { %v1674_v17 = vpop.permute.xlu1 %230  ;;  %1267 = vtanh.f32 %v431_v9  ;;  %v368_v52 = vadd.f32 %v336_v31, %v216_v22  ;;  %v373_v53 = vadd.f32 %v341_v26, %v221_v33  ;;  %v375_v10 = vadd.f32 %v343_v29, %v223_v34 }
  0xcd   :  { %v317_v30 = vmul.f32 %v288_v58, %v1674_v17  ;;  %1269 = vtanh.f32 %v409_v16  ;;  %v318_v15 = vmul.f32 %v1620_v51, %v1674_v17  ;;  %v320_v50 = vmul.f32 %v1650_v5, %v1674_v17 }
  0xce   :  { %1271 = vtanh.f32 %v411_v32  ;;  %v208_v24 = vmul.f32 %v1642_v1, %v1614_v44  ;;  %v199_v51 = vmul.f32 %v1612_v41, %v1670_v13  ;;  %v428_v22 = vadd.f32 %v1632_v60, %v376_v48 }
  0xcf   :  { %v349_v36 = vadd.f32 %v317_v30, %v197_v12  ;;  %1273 = vtanh.f32 %v410_v14  ;;  %v211_v5 = vmul.f32 %v1624_v55, %v1614_v44  ;;  %v350_v26 = vadd.f32 %v318_v15, %v198_v19 }
  0xd0   :  { %v425_v29 = vadd.f32 %v1632_v60, %v373_v53  ;;  %v228_v1 = vmul.f32 %v1644_v2, %v1616_v45  ;;  %v352_v12 = vadd.f32 %v320_v50, %v200_v47  ;;  %v427_v41 = vadd.f32 %v1632_v60, %v375_v10  ;;  %v1967_v10 = vld [vmem:[#allocation16_spill] sm:$0xff] }
  0xd1   :  { %v1728_v46 = vpop.permute.xlu1 %393  ;;  %v363_v45 = vadd.f32 %v1720_v39, %v211_v5  ;;  %v378_v34 = vadd.f32 %v1682_v21, %v226_v4  ;;  %v371_v39 = vadd.f32 %v1724_v42, %v1660_v8  ;;  %v332_v21 = vmul.f32 %v1652_v6, %v1608_v28 }
  0xd2   :  { %v417_v35 = vadd.f32 %v1728_v46, %v365_v11  ;;  %v419_v40 = vadd.f32 %v1728_v46, %v367_v18  ;;  %v418_v9 = vadd.f32 %v1728_v46, %v366_v57  ;;  %v209_v11 = vmul.f32 %v1622_v54, %v1614_v44 }
  0xd3   :  { %v420_v61 = vadd.f32 %v1728_v46, %v368_v52  ;;  %v319_v57 = vmul.f32 %v1630_v59, %v1674_v17  ;;  %v369_v59 = vadd.f32 %v1712_v37, %v1656_v7  ;;  %v360_v18 = vadd.f32 %v328_v3, %v208_v24 }
  0xd4   :  { %1275 = vtanh.f32 %v417_v35  ;;  %v361_v32 = vadd.f32 %v1716_v38, %v209_v11  ;;  %v340_v37 = vmul.f32 %v1652_v6, %v1606_v27  ;;  %v380_v38 = vadd.f32 %v1694_v25, %v228_v1 }
  0xd5   :  { %v1759_v58 = vpop.permute.xlu1 %383  ;;  %1277 = vtanh.f32 %v419_v40  ;;  %v351_v31 = vadd.f32 %v319_v57, %v199_v51  ;;  %v412_v14 = vadd.f32 %v1726_v43, %v360_v18  ;;  %v201_v19 = vmul.f32 %v1622_v54, %v1670_v13  ;;  %v465_v18 = vld [vmem:[#allocation8] sm:$0xff] }
  0xd6   :  { %v401_v49 = vadd.f32 %v1759_v58, %v349_v36  ;;  %v402_v30 = vadd.f32 %v1759_v58, %v350_v26  ;;  %v404_v33 = vadd.f32 %v1759_v58, %v352_v12  ;;  %v413_v36 = vadd.f32 %v1726_v43, %v361_v32 }
  0xd7   :  { %v1264_v16 = vpop.eup %1263  ;;  %v403_v7 = vadd.f32 %v1759_v58, %v351_v31  ;;  %v415_v27 = vadd.f32 %v1726_v43, %v363_v45  ;;  %v210_v25 = vmul.f32 %v1638_v63, %v1614_v44  ;;  %v203_v8 = vmul.f32 %v1624_v55, %v1670_v13 }
  0xd8   :  { %1279 = vtanh.f32 %v401_v49  ;;  %530 = vmatprep.subr.mxu0 %v1264_v16  ;;  %v1802_v35 = vpop.eup %1265  ;;  %v430_v42 = vadd.f32 %v1632_v60, %v378_v34  ;;  %v370_v28 = vadd.f32 %v1743_v62, %v1678_v20  ;;  %v212_v54 = vmul.f32 %v1644_v2, %v1614_v44  ;;  %v466_v34 = vld [vmem:[#allocation8 + $0x8] sm:$0xff] }
  0xd9   :  { %1281 = vtanh.f32 %v418_v9  ;;  %v1808_v3 = vpop.eup %1267  ;;  %v432_v47 = vadd.f32 %v1632_v60, %v380_v38  ;;  %v372_v48 = vadd.f32 %v340_v37, %v1688_v23  ;;  %v202_v15 = vmul.f32 %v1638_v63, %v1670_v13 }
  0xda   :  { %1283 = vtanh.f32 %v420_v61  ;;  %v1815_v4 = vpop.eup %1269  ;;  %v322_v55 = vmul.f32 %v1640_v0, %v1674_v17  ;;  %v422_v52 = vadd.f32 %v1728_v46, %v370_v28  ;;  %v204_v20 = vmul.f32 %v1644_v2, %v1670_v13  ;;  %v1966_v0 = vld [vmem:[#allocation17_spill] sm:$0xff] }
  0xdb   :  { %1285 = vtanh.f32 %v428_v22  ;;  %v1822_v40 = vpop.eup %1271  ;;  %v324_v44 = vmul.f32 %v1652_v6, %v1674_v17  ;;  %v424_v60 = vadd.f32 %v1728_v46, %v372_v48  ;;  %v321_v62 = vmul.f32 %v1626_v56, %v1674_v17 }
  0xdc   :  { %1287 = vtanh.f32 %v425_v29  ;;  %v1274_v49 = vpop.eup %1273  ;;  %v421_v63 = vadd.f32 %v1728_v46, %v369_v59  ;;  %v362_v9 = vadd.f32 %v1966_v0, %v210_v25  ;;  %v323_v11 = vmul.f32 %v1967_v10, %v1674_v17 }
  0xdd   :  { %1289 = vtanh.f32 %v427_v41  ;;  %v423_v2 = vadd.f32 %v1728_v46, %v371_v39  ;;  %v364_v13 = vadd.f32 %v332_v21, %v212_v54  ;;  %v354_v61 = vadd.f32 %v322_v55, %v202_v15  ;;  %v467_v21 = vld [vmem:[#allocation8 + $0x10] sm:$0xff]  ;;  %v1894_v54 = vpop.permute.xlu0 %490 }
  0xde   :  { %1291 = vtanh.f32 %v402_v30  ;;  %v414_v24 = vadd.f32 %v1726_v43, %v362_v9  ;;  %v356_v57 = vadd.f32 %v324_v44, %v204_v20  ;;  %v353_v5 = vadd.f32 %v321_v62, %v201_v19 }
  0xdf   :  { %1293 = vtanh.f32 %v404_v33  ;;  %v416_v56 = vadd.f32 %v1726_v43, %v364_v13  ;;  %v406_v26 = vadd.f32 %v1759_v58, %v354_v61  ;;  %v355_v46 = vadd.f32 %v323_v11, %v203_v8 }
  0xe0   :  { %1295 = vtanh.f32 %v412_v14  ;;  %v408_v29 = vadd.f32 %v1759_v58, %v356_v57  ;;  %v405_v12 = vadd.f32 %v1759_v58, %v353_v5  ;;  %v1968_v37 = vmov 0.0  }
  0xe1   :  { %1297 = vtanh.f32 %v403_v7  ;;  %v1276_v53 = vpop.eup %1275  ;;  %v407_v43 = vadd.f32 %v1759_v58, %v355_v46 }
  0xe2   :  { %1299 = vtanh.f32 %v413_v36  ;;  %v1278_v23 = vpop.eup %1277 }
  0xe3   :  { %1301 = vtanh.f32 %v415_v27  ;;  %v468_v27 = vld [vmem:[#allocation8 + $0x18] sm:$0xff] }
  0xe4   :  { %1303 = vtanh.f32 %v430_v42  ;;  %v1892_v42 = vpop.permute.xlu1 %485 }
  0xe5   :  { %v1280_v50 = vpop.eup %1279  ;;  %1305 = vtanh.f32 %v432_v47 }
  0xe6   :  { %v1282_v6 = vpop.eup %1281  ;;  %1307 = vtanh.f32 %v422_v52 }
  0xe7   :  { %v1284_v51 = vpop.eup %1283  ;;  %1309 = vtanh.f32 %v424_v60 }
  0xe8   :  { %v1286_v22 = vpop.eup %1285  ;;  %1311 = vtanh.f32 %v421_v63  ;;  %v1896_v15 = vpop.permute.xlu1 %475 }
  0xe9   :  { %v1288_v17 = vpop.eup %1287  ;;  %1313 = vtanh.f32 %v423_v2  ;;  %619 = vmatprep.subr.mxu1 %v1286_v22 }
  0xea   :  { %v1290_v1 = vpop.eup %1289  ;;  %531 = vmatpush1.msra.mxu0 %v1288_v17  ;;  %1315 = vtanh.f32 %v414_v24 }
  0xeb   :  { %v1292_v41 = vpop.eup %1291  ;;  %620 = vmatpush1.msra.mxu1 %v1290_v1  ;;  %532 = vmatprep.subr.mxu0 %v1282_v6  ;;  %1317 = vtanh.f32 %v416_v56 }
  0xec   :  { %v1294_v16 = vpop.eup %1293  ;;  %621 = vmatprep.subr.mxu1 %v1284_v51  ;;  %533 = vmatpush1.msra.mxu0 %v1276_v53  ;;  %1319 = vtanh.f32 %v406_v26  ;;  %v1899_v53 = vpop.permute.xlu0 %480 }
  0xed   :  { %v1296_v59 = vpop.eup %1295  ;;  %622 = vmatpush1.msra.mxu1 %v1278_v23  ;;  %534 = vmatprep.subr.mxu0 %v1274_v49  ;;  %1321 = vtanh.f32 %v408_v29 }
  0xee   :  { %v1298_v30 = vpop.eup %1297  ;;  %1323 = vtanh.f32 %v405_v12  ;;  %623 = vmatprep.subr.mxu1 %v1296_v59  ;;  %535 = vmatpush1.msra.mxu0 %v1815_v4 }
  0xef   :  { %v1300_v32 = vpop.eup %1299  ;;  %1325 = vtanh.f32 %v407_v43  ;;  %624 = vmatpush1.msra.mxu1 %v1822_v40  ;;  %536 = vmatprep.subr.mxu0 %v1292_v41 }
  0xf0   :  { %v1302_v58 = vpop.eup %1301  ;;  %625 = vmatprep.subr.mxu1 %v1294_v16  ;;  %537 = vmatpush1.msra.mxu0 %v1280_v50 }
  0xf1   :  { %v1304_v31 = vpop.eup %1303  ;;  %626 = vmatpush1.msra.mxu1 %v1298_v30  ;;  %1225 = vmatmul.mubr.msk.f32.vlgmr.msra.gmra.mxu0 %vm493_vm0, %v465_v18 }
  0xf2   :  { %v1306_v33 = vpop.eup %1305  ;;  %1229 = vmatmul.mubr.msk.f32.vlgmr.msra.gmra.mxu1 %vm493_vm0, %v465_v18  ;;  %708 = vmatprep.subr.mxu0 %v1304_v31 }
  0xf3   :  { %v1308_v45 = vpop.eup %1307  ;;  %797 = vmatprep.subr.mxu1 %v1306_v33  ;;  %709 = vmatpush1.msra.mxu0 %v1802_v35 }
  0xf4   :  { %v1310_v14 = vpop.eup %1309  ;;  %798 = vmatpush1.msra.mxu1 %v1808_v3  ;;  %710 = vmatprep.subr.mxu0 %v1308_v45 }
  0xf5   :  { %v1312_v7 = vpop.eup %1311  ;;  %799 = vmatprep.subr.mxu1 %v1310_v14  ;;  %576 = vmatprep.mubr.f32.mxu0 %v1968_v37 }
  0xf6   :  { %v1314_v38 = vpop.eup %1313  ;;  %665 = vmatprep.mubr.f32.mxu1 %v1968_v37  ;;  %711 = vmatpush1.msra.mxu0 %v1312_v7 }
  0xf7   :  { %v1316_v36 = vpop.eup %1315  ;;  %800 = vmatpush1.msra.mxu1 %v1314_v38  ;;  %1226 = vmatmul.mubr.msk.f32.gmra.mxu0 %vm493_vm0, %v466_v34 }
  0xf8   :  { %v1318_v39 = vpop.eup %1317  ;;  %1230 = vmatmul.mubr.msk.f32.gmra.mxu1 %vm493_vm0, %v466_v34  ;;  %712 = vmatprep.subr.mxu0 %v1316_v36 }
  0xf9   :  { %v1320_v35 = vpop.eup %1319  ;;  %801 = vmatprep.subr.mxu1 %v1318_v39  ;;  %713 = vmatpush1.msra.mxu0 %v1300_v32 }
  0xfa   :  { %v1322_v3 = vpop.eup %1321  ;;  %802 = vmatpush1.msra.mxu1 %v1302_v58  ;;  %714 = vmatprep.subr.mxu0 %v1320_v35 }
  0xfb   :  { %v1324_v4 = vpop.eup %1323  ;;  %803 = vmatprep.subr.mxu1 %v1322_v3  ;;  %582 = vmatprep.mubr.f32.mxu0 %v1968_v37 }
  0xfc   :  { %v1326_v19 = vpop.eup %1325  ;;  %671 = vmatprep.mubr.f32.mxu1 %v1968_v37  ;;  %715 = vmatpush1.msra.mxu0 %v1324_v4 }
  0xfd   :  { %804 = vmatpush1.msra.mxu1 %v1326_v19  ;;  %1227 = vmatmul.mubr.msk.f32.gmra.mxu0 %vm493_vm0, %v467_v21 }
  0xfe   :  { %1231 = vmatmul.mubr.msk.f32.gmra.mxu1 %vm493_vm0, %v467_v21  ;;  %588 = vmatprep.mubr.f32.mxu0 %v1968_v37 }
  0xff   :  { %677 = vmatprep.mubr.f32.mxu1 %v1968_v37 }
 0x101   :  { %1228 = vmatmul.mubr.msk.f32.gmra.mxu0 %vm493_vm0, %v468_v27 }
 0x102   :  { %1232 = vmatmul.mubr.msk.f32.gmra.mxu1 %vm493_vm0, %v468_v27  ;;  %748 = vmatprep.mubr.f32.mxu0 %v1968_v37 }
 0x103   :  { %837 = vmatprep.mubr.f32.mxu1 %v1968_v37 }
 0x105   :  { %1233 = vmatmul.mubr.msk.f32.vlgmr.msra.gmra.mxu0 %vm493_vm0, %v465_v18 }
 0x106   :  { %1237 = vmatmul.mubr.msk.f32.vlgmr.msra.gmra.mxu1 %vm493_vm0, %v465_v18  ;;  %754 = vmatprep.mubr.f32.mxu0 %v1968_v37 }
 0x107   :  { %843 = vmatprep.mubr.f32.mxu1 %v1968_v37 }
 0x109   :  { %1234 = vmatmul.mubr.msk.f32.gmra.mxu0 %vm493_vm0, %v466_v34 }
 0x10a   :  { %1238 = vmatmul.mubr.msk.f32.gmra.mxu1 %vm493_vm0, %v466_v34  ;;  %760 = vmatprep.mubr.f32.mxu0 %v1968_v37 }
 0x10b   :  { %849 = vmatprep.mubr.f32.mxu1 %v1968_v37 }
 0x10d   :  { %1235 = vmatmul.mubr.msk.f32.gmra.mxu0 %vm493_vm0, %v467_v21 }
 0x10e   :  { %1239 = vmatmul.mubr.msk.f32.gmra.mxu1 %vm493_vm0, %v467_v21  ;;  %766 = vmatprep.mubr.f32.mxu0 %v1968_v37 }
 0x10f   :  { %855 = vmatprep.mubr.f32.mxu1 %v1968_v37 }
 0x111   :  { %1236 = vmatmul.mubr.msk.f32.gmra.mxu0 %vm493_vm0, %v468_v27 }
 0x112   :  { %1240 = vmatmul.mubr.msk.f32.gmra.mxu1 %vm493_vm0, %v468_v27  ;;  %968 = vmatprep.mubr.f32.mxu0 %v1968_v37 }
 0x113   :  { %1039 = vmatprep.mubr.f32.mxu1 %v1968_v37 }
 0x1b1   :  { %v572_v25 = vpop.f32.mrf.mxu0 }
 0x1b2   :  { %v661_v40 = vpop.f32.mrf.mxu1  ;;  %v573_v52 = vadd.f32 %v572_v25, %v1896_v15 }
 0x1b3   :  { %v574_v8 = vpop.f32.mrf.mxu0  ;;  %v662_v41 = vadd.f32 %v661_v40, %v1896_v15 }
 0x1b4   :  { %v663_v28 = vpop.f32.mrf.mxu1  ;;  %v575_v20 = vadd.f32 %v574_v8, %v1896_v15  ;;  %1327 = vtanh.f32 %v573_v52 }
 0x1b5   :  { %v664_v1 = vadd.f32 %v663_v28, %v1896_v15 }
 0x1b6   :  { %1329 = vtanh.f32 %v575_v20 }
 0x1b7   :  { %v578_v47 = vpop.f32.mrf.mxu0 }
 0x1b8   :  { %v667_v48 = vpop.f32.mrf.mxu1  ;;  %v579_v44 = vadd.f32 %v578_v47, %v1899_v53 }
 0x1b9   :  { %v580_v49 = vpop.f32.mrf.mxu0  ;;  %v668_v46 = vadd.f32 %v667_v48, %v1899_v53 }
 0x1ba   :  { %v669_v55 = vpop.f32.mrf.mxu1  ;;  %v581_v23 = vadd.f32 %v580_v49, %v1899_v53  ;;  %1331 = vtanh.f32 %v579_v44 }
 0x1bb   :  { %v670_v26 = vadd.f32 %v669_v55, %v1899_v53 }
 0x1bc   :  { %1333 = vtanh.f32 %v581_v23 }
 0x1bd   :  { %v584_v60 = vpop.f32.mrf.mxu0 }
 0x1be   :  { %v673_v62 = vpop.f32.mrf.mxu1  ;;  %v585_v63 = vadd.f32 %v584_v60, %v1892_v42 }
 0x1bf   :  { %v586_v0 = vpop.f32.mrf.mxu0  ;;  %v674_v22 = vadd.f32 %v673_v62, %v1892_v42 }
 0x1c0   :  { %v587_v9 = vadd.f32 %v586_v0, %v1892_v42  ;;  %v675_v50 = vpop.f32.mrf.mxu1  ;;  %1335 = vtanh.f32 %v585_v63 }
 0x1c1   :  { %v590_v10 = vpop.f32.mrf.mxu0  ;;  %v676_v51 = vadd.f32 %v675_v50, %v1892_v42  ;;  %v1921_v30 = vpop.eup %1327 }
 0x1c2   :  { %v591_v11 = vadd.f32 %v590_v10, %v1894_v54  ;;  %v679_v2 = vpop.f32.mrf.mxu1  ;;  %1337 = vtanh.f32 %v587_v9 }
 0x1c3   :  { %v592_v13 = vpop.f32.mrf.mxu0  ;;  %v680_v6 = vadd.f32 %v679_v2, %v1894_v54  ;;  %v1330_v58 = vpop.eup %1329 }
 0x1c4   :  { %v593_v24 = vadd.f32 %v592_v13, %v1894_v54  ;;  %v681_v61 = vpop.f32.mrf.mxu1  ;;  %1339 = vtanh.f32 %v591_v11 }
 0x1c5   :  { %v682_v56 = vadd.f32 %v681_v61, %v1894_v54  ;;  %v750_v57 = vpop.f32.mrf.mxu0 }
 0x1c6   :  { %1341 = vtanh.f32 %v593_v24  ;;  %v1912_v5 = vpop.f32.mrf.mxu1  ;;  %v751_v16 = vadd.f32 %v750_v57, %v1896_v15 }
 0x1c7   :  { %1343 = vtanh.f32 %v682_v56  ;;  %v752_v17 = vpop.f32.mrf.mxu0  ;;  %v1332_v45 = vpop.eup %1331  ;;  %v840_v10 = vadd.f32 %v1912_v5, %v1896_v15 }
 0x1c8   :  { %1345 = vtanh.f32 %v680_v6  ;;  %v1916_v29 = vpop.f32.mrf.mxu1  ;;  %v753_v18 = vadd.f32 %v752_v17, %v1896_v15 }
 0x1c9   :  { %1347 = vtanh.f32 %v676_v51  ;;  %v756_v12 = vpop.f32.mrf.mxu0  ;;  %v1334_v7 = vpop.eup %1333  ;;  %v842_v9 = vadd.f32 %v1916_v29, %v1896_v15 }
 0x1ca   :  { %1349 = vtanh.f32 %v674_v22  ;;  %v845_v43 = vpop.f32.mrf.mxu1  ;;  %v757_v31 = vadd.f32 %v756_v12, %v1899_v53  ;;  %v899_v12 = vpop.permute.xlu0 %898 }
 0x1cb   :  { %1351 = vtanh.f32 %v670_v26  ;;  %v758_v59 = vpop.f32.mrf.mxu0  ;;  %v846_v0 = vadd.f32 %v845_v43, %v1899_v53 }
 0x1cc   :  { %1353 = vtanh.f32 %v668_v46  ;;  %v847_v32 = vpop.f32.mrf.mxu1  ;;  %v759_v14 = vadd.f32 %v758_v59, %v1899_v53 }
 0x1cd   :  { %1355 = vtanh.f32 %v664_v1  ;;  %v762_v33 = vpop.f32.mrf.mxu0  ;;  %v1336_v39 = vpop.eup %1335  ;;  %v848_v62 = vadd.f32 %v847_v32, %v1899_v53 }
 0x1ce   :  { %1357 = vtanh.f32 %v662_v41  ;;  %v851_v34 = vpop.f32.mrf.mxu1  ;;  %v763_v38 = vadd.f32 %v762_v33, %v1892_v42 }
 0x1cf   :  { %1359 = vtanh.f32 %v751_v16  ;;  %v764_v36 = vpop.f32.mrf.mxu0  ;;  %v1338_v21 = vpop.eup %1337  ;;  %v852_v60 = vadd.f32 %v851_v34, %v1892_v42 }
 0x1d0   :  { %1361 = vtanh.f32 %v753_v18  ;;  %v765_v35 = vadd.f32 %v764_v36, %v1892_v42  ;;  %v853_v3 = vpop.f32.mrf.mxu1 }
 0x1d1   :  { %1363 = vtanh.f32 %v757_v31  ;;  %v768_v4 = vpop.f32.mrf.mxu0  ;;  %v1340_v19 = vpop.eup %1339  ;;  %v854_v52 = vadd.f32 %v853_v3, %v1892_v42  ;;  %v894_v42 = vld [vmem:[%s1958_s5] sm:$0xf]  ;;  %s1529_s5 = smov [#allocation11]  }
 0x1d2   :  { %1365 = vtanh.f32 %v759_v14  ;;  %v769_v27 = vadd.f32 %v768_v4, %v1894_v54  ;;  %v857_v25 = vpop.f32.mrf.mxu1  ;;  %s1214_s26 = sshll.u32 %s1529_s5, 4  ;;  %s1215_s26 = int_to_ptr.vmem [resolvable:$true] %s1214_s26 }
 0x1d3   :  { %v1342_v40 = vpop.eup %1341  ;;  %1367 = vtanh.f32 %v763_v38  ;;  %v770_v8 = vpop.f32.mrf.mxu0  ;;  %v858_v47 = vadd.f32 %v857_v25, %v1894_v54  ;;  %s1491_s27 = scalar_lea.vmem %s1215_s26, 512  ;;  %p1496_p12 = scmp.lt.s32.totalorder %s1215_s26, %s1215_s26 }
 0x1d4   :  { %v1344_v28 = vpop.eup %1343  ;;  %1369 = vtanh.f32 %v765_v35  ;;  %v771_v48 = vadd.f32 %v770_v8, %v1894_v54  ;;  %v859_v49 = vpop.f32.mrf.mxu1  ;;  %928 = vmatprep.subr.mxu0 %v1342_v40  ;;  %p1492_p11 = scmp.ne.s32.totalorder %s1215_s26, %s1491_s27  ;;  %p1497_p13 = scmp.lt.s32.totalorder %s1491_s27, %s1491_s27 }
 0x1d5   :  { %v1346_v55 = vpop.eup %1345  ;;  %1371 = vtanh.f32 %v769_v27  ;;  %v860_v20 = vadd.f32 %v859_v49, %v1894_v54  ;;  %999 = vmatprep.subr.mxu1 %v1344_v28  ;;  %929 = vmatpush1.msra.mxu0 %v1340_v19 }
 0x1d6   :  { %v1348_v44 = vpop.eup %1347  ;;  %1373 = vtanh.f32 %v771_v48  ;;  %1000 = vmatpush1.msra.mxu1 %v1346_v55  ;;  %930 = vmatprep.subr.mxu0 %v1338_v21  ;;  %p1498_p0 = por %p1497_p13, %p1496_p12 }
 0x1d7   :  { %v1350_v23 = vpop.eup %1349  ;;  %1375 = vtanh.f32 %v860_v20  ;;  %1001 = vmatprep.subr.mxu1 %v1348_v44  ;;  %931 = vmatpush1.msra.mxu0 %v1336_v39 }
 0x1d8   :  { %v1352_v63 = vpop.eup %1351  ;;  %1377 = vtanh.f32 %v858_v47  ;;  %1002 = vmatpush1.msra.mxu1 %v1350_v23  ;;  %932 = vmatprep.subr.mxu0 %v1334_v7  ;;  %p1499_p1 = pnand %p1498_p0, %p1492_p11 }
 0x1d9   :  { %v1354_v54 = vpop.eup %1353  ;;  %1379 = vtanh.f32 %v854_v52  ;;  %1003 = vmatprep.subr.mxu1 %v1352_v63  ;;  %933 = vmatpush1.msra.mxu0 %v1332_v45 }
 0x1da   :  { %v1356_v50 = vpop.eup %1355  ;;  %1381 = vtanh.f32 %v852_v60  ;;  %1004 = vmatpush1.msra.mxu1 %v1354_v54  ;;  %934 = vmatprep.subr.mxu0 %v1330_v58 }
 0x1db   :  { %v1358_v53 = vpop.eup %1357  ;;  %1383 = vtanh.f32 %v848_v62  ;;  %1005 = vmatprep.subr.mxu1 %v1356_v50  ;;  %935 = vmatpush1.msra.mxu0 %v1921_v30 }
 0x1dc   :  { %v1360_v11 = vpop.eup %1359  ;;  %1385 = vtanh.f32 %v846_v0  ;;  %1006 = vmatpush1.msra.mxu1 %v1358_v53  ;;  %1241 = vmatmul.mubr.msk.f32.vlgmr.msra.gmra.mxu0 %vm493_vm0, %v894_v42 }
 0x1dd   :  { %v1362_v2 = vpop.eup %1361  ;;  %1387 = vtanh.f32 %v842_v9  ;;  %1242 = vmatmul.mubr.msk.f32.vlgmr.msra.gmra.mxu1 %vm493_vm0, %v894_v42  ;;  %1110 = vmatprep.mubr.f32.mxu0 %v1968_v37 }
 0x1de   :  { %v1364_v15 = vpop.eup %1363  ;;  %1389 = vtanh.f32 %v840_v10  ;;  %1181 = vmatprep.mubr.f32.mxu1 %v1968_v37 }
 0x1df   :  { %v1366_v13 = vpop.eup %1365 }
 0x1e0   :  { %v1368_v6 = vpop.eup %1367 }
 0x1e1   :  { %v1370_v24 = vpop.eup %1369 }
 0x1e2   :  { %v1372_v61 = vpop.eup %1371 }
 0x1e3   :  { %v1374_v51 = vpop.eup %1373 }
 0x1e4   :  { %v1376_v56 = vpop.eup %1375  ;;  %1070 = vmatprep.subr.mxu0 %v1374_v51 }
 0x1e5   :  { %v1378_v57 = vpop.eup %1377  ;;  %1141 = vmatprep.subr.mxu1 %v1376_v56  ;;  %1071 = vmatpush1.msra.mxu0 %v1372_v61 }
 0x1e6   :  { %v1380_v22 = vpop.eup %1379  ;;  %1142 = vmatpush1.msra.mxu1 %v1378_v57  ;;  %1072 = vmatprep.subr.mxu0 %v1370_v24 }
 0x1e7   :  { %v1382_v5 = vpop.eup %1381  ;;  %1143 = vmatprep.subr.mxu1 %v1380_v22  ;;  %1073 = vmatpush1.msra.mxu0 %v1368_v6 }
 0x1e8   :  { %v1384_v26 = vpop.eup %1383  ;;  %1144 = vmatpush1.msra.mxu1 %v1382_v5  ;;  %1074 = vmatprep.subr.mxu0 %v1366_v13 }
 0x1e9   :  { %v1386_v37 = vpop.eup %1385  ;;  %1145 = vmatprep.subr.mxu1 %v1384_v26  ;;  %1075 = vmatpush1.msra.mxu0 %v1364_v15 }
 0x1ea   :  { %v1388_v17 = vpop.eup %1387  ;;  %1146 = vmatpush1.msra.mxu1 %v1386_v37  ;;  %1076 = vmatprep.subr.mxu0 %v1362_v2 }
 0x1eb   :  { %v1390_v46 = vpop.eup %1389  ;;  %1147 = vmatprep.subr.mxu1 %v1388_v17  ;;  %1077 = vmatpush1.msra.mxu0 %v1360_v11 }
 0x1ec   :  { %1148 = vmatpush1.msra.mxu1 %v1390_v46  ;;  %1243 = vmatmul.mubr.msk.f32.vlgmr.msra.gmra.mxu0 %vm493_vm0, %v894_v42 }
 0x1ed   :  { %1244 = vmatmul.mubr.msk.f32.vlgmr.msra.gmra.mxu1 %vm493_vm0, %v894_v42 }
 0x29c   :  { %v970_v29 = vpop.f32.mrf.mxu0 }
 0x29d   :  { %v1041_v1 = vpop.f32.mrf.mxu1  ;;  %v971_v43 = vadd.f32 %v970_v29, %v899_v12 }
 0x29e   :  { %v972_v41 = vpop.f32.mrf.mxu0  ;;  %v1042_v30 = vadd.f32 %v1041_v1, %v899_v12 }
 0x29f   :  { %v973_v16 = vadd.f32 %v972_v41, %v899_v12  ;;  %v1043_v59 = vpop.f32.mrf.mxu1 }
 0x2a0   :  { %v1044_v18 = vadd.f32 %v1043_v59, %v899_v12 }
 0x2a1   :  { %v1196_v32 = vcombine.low %v971_v43, %v973_v16 }
 0x2a2   :  { %v1197_v58 = vcombine.low %v1042_v30, %v1044_v18 }
 0x2a3   :  { %1204 = vst [vmem:[#allocation11] sm:$0xff] %v1196_v32 }
 0x2a4   :  { %1205 = vst [vmem:[#allocation11 + $0x8] sm:$0xff] %v1197_v58 }
 0x2ac   :  { %v1112_v31 = vpop.f32.mrf.mxu0 }
 0x2ad   :  { %v1183_v33 = vpop.f32.mrf.mxu1  ;;  %v1113_v14 = vadd.f32 %v1112_v31, %v899_v12 }
 0x2ae   :  { %v1114_v45 = vpop.f32.mrf.mxu0  ;;  %v1184_v38 = vadd.f32 %v1183_v33, %v899_v12 }
 0x2af   :  { %v1115_v34 = vadd.f32 %v1114_v45, %v899_v12  ;;  %v1185_v7 = vpop.f32.mrf.mxu1 }
 0x2b0   :  { %v1186_v36 = vadd.f32 %v1185_v7, %v899_v12 }
 0x2b1   :  { %v1198_v39 = vcombine.low %v1113_v14, %v1115_v34 }
 0x2b2   :  { %v1199_v35 = vcombine.low %v1184_v38, %v1186_v36 }
 0x2b3   :  { %1206 = vst [vmem:[#allocation11 + $0x10] sm:$0xff] %v1198_v39 }
 0x2b4   :  { %1207 = vst [vmem:[#allocation11 + $0x18] sm:$0xff] %v1199_v35 }
 0x2b5   :  { %1502 = shalt.err (!%p1499_p1)
}
 0x2b6   :  { %1217 = dma.vmem_to_hbm [thread:$0]  %s1215_s26, 512, %s1960_s7, [#allocation4]  }
 0x2b7   :  { %1517 = dma.done.wait [#allocation4], 512  }
 0x2b8   :  { %1518 = vsyncadd [#allocation4], 4294966784 }
 0x2b9   :  { %1221 = vsyncpa [#allocation3], 1 }
 0x2ba   :  { %1222 = vsyncpa [#allocation6], 1 }
 0x2bb   :  { %1223 = vsyncpa [#allocation9], 1 }
 0x2bc   :  { %1224 = vsyncpa [#allocation4], 1 }

</bundles_post_ra>
